<compile_context>
chip_gen: v6e
topology: v6e:2x2x1
jax: 0.10.0
libtpu: 0.0.40
codegen_flags: <defaults>
</compile_context>

<pallas_src>
import functools

import jax
import jax.numpy as jnp
from jax import lax
from jax.experimental import pallas as pl
from jax.experimental.pallas import tpu as pltpu

NP = 128  # padded pairwise dimension (lane-aligned); batch must satisfy n <= NP
# TODO(synk): for n > 128, add a (row-tile, col-tile) grid with an SMEM accumulator for
# (num, den); not needed for the typical batch sizes this loss is used with.


def _pairwise_hinge_kernel(n_ref, data_ref, out_ref, *, margin: float):
    # data_ref: (8, NP) f32 in VMEM.  row 0 = y_hat, row 1 = efs_time, row 2 = efs.
    n = n_ref[0]                       # dynamic batch size (SMEM scalar)

    y_r = data_ref[0:1, :]             # (1, NP)  y_hat[j]      ("right" / column index)
    t_r = data_ref[1:2, :]             # (1, NP)  efs_time[j]
    e_r = data_ref[2:3, :]             # (1, NP)  efs[j]

    # Sublane-broadcast the rows to full pairwise matrices; "left" (row-index) views via
    # XLU transpose (free slot here).
    y_rb = jnp.broadcast_to(y_r, (NP, NP))
    t_rb = jnp.broadcast_to(t_r, (NP, NP))
    e_rb = jnp.broadcast_to(e_r, (NP, NP))
    y_lb = y_rb.T                      # y_hat[i]
    t_lb = t_rb.T                      # efs_time[i]
    e_lb = e_rb.T                      # efs[i]

    # pair (i, j): only i < j < n counts (upper triangle of the real batch; padding dies here).
    ii = lax.broadcasted_iota(jnp.int32, (NP, NP), 0)
    jj = lax.broadcasted_iota(jnp.int32, (NP, NP), 1)
    pair_valid = (ii < jj) & (jj < n)

    # hinge:  y = 2*(t_l < t_r) - 1  (exactly +/-1)  =>  fold the sign into a select:
    #   loss = relu(-y*(y_hat_l - y_hat_r) + margin) = relu(where(lt, -diff, diff) + margin)
    diff = y_lb - y_rb
    lt = t_lb < t_rb
    gt = t_lb > t_rb
    signed = jnp.where(lt, -diff, diff)
    loss = jnp.maximum(signed + margin, 0.0)

    # mask = (efs_l==1 | efs_r==1) & ~invalid, collapsed to boolean form:
    #   el & er                        -> always valid
    #   el & ~er                       -> valid iff t_l <  t_r
    #   ~el & er                       -> valid iff t_l >  t_r
    #   ~el & ~er                      -> dropped by the keep filter
    el = e_lb != 0.0
    er = e_rb != 0.0
    mask = ((el & er) | (el & lt) | (er & gt)) & pair_valid

    wf = mask.astype(jnp.float32)
    num = jnp.sum(loss * wf)
    den = jnp.sum(wf)
    out_ref[0, 0] = num / den


def pairwise_hinge_loss(y_hat: jax.Array, efs_time: jax.Array, efs: jax.Array,
                        margin: float) -> jax.Array:
    """JAX/Pallas equivalent of PairwiseHingeLoss.forward."""
    y_hat = jnp.squeeze(y_hat)
    n = efs_time.shape[0]
    assert y_hat.shape[0] == n
    assert n <= NP, "batch size must fit in one padded tile"

    # Single fused pad: stack the three vectors and drop them into a zeroed (8, NP) slab.
    data = jnp.stack([y_hat.astype(jnp.float32),
                      efs_time.astype(jnp.float32),
                      efs.astype(jnp.float32)], axis=0)                 # (3, n)
    packed = lax.dynamic_update_slice(jnp.zeros((8, NP), jnp.float32), data, (0, 0))
    n_arr = jnp.array([n], dtype=jnp.int32)

    kernel = functools.partial(_pairwise_hinge_kernel, margin=float(margin))

    out = pl.pallas_call(
        kernel,
        out_shape=jax.ShapeDtypeStruct((1, 1), jnp.float32),
        grid_spec=pltpu.PrefetchScalarGridSpec(
            num_scalar_prefetch=1,
            grid=(1,),
            in_specs=[pl.BlockSpec((8, NP), lambda i, n_ref: (0, 0))],
            out_specs=pl.BlockSpec(memory_space=pltpu.MemorySpace.SMEM),
        ),
        compiler_params=pltpu.CompilerParams(
            dimension_semantics=("arbitrary",)),
    )(n_arr, packed)
    return out[0, 0]


def _reference(y_hat, efs_time, efs, margin):
    """Pure-JAX reference reproducing the PyTorch semantics."""
    y_hat = jnp.squeeze(y_hat)
    n = efs_time.shape[0]
    ii, jj = jnp.triu_indices(n, k=1)
    keep = (efs[ii] == 1) | (efs[jj] == 1)
    ii, jj = ii[keep], jj[keep]
    pl_, pr_ = y_hat[ii], y_hat[jj]
    tl_, tr_ = efs_time[ii], efs_time[jj]
    y = 2.0 * (tl_ < tr_).astype(jnp.float32) - 1.0
    loss = jnp.maximum(-y * (pl_ - pr_) + margin, 0.0)
    inv1 = (efs[ii] == 1) & (efs[jj] == 0) & (tl_ >= tr_)
    inv2 = (efs[ii] == 0) & (efs[jj] == 1) & (tl_ <= tr_)
    mask = jnp.logical_not(inv1 | inv2)
    w = mask.astype(jnp.float32)
    return jnp.sum(loss * w) / jnp.sum(w)


if __name__ == "__main__":
    key = jax.random.PRNGKey(0)
    margin = 0.5

    # --- case 1: N = 8 (vreg-row aligned) ---
    k1, k2 = jax.random.split(key)
    N = 8
    y_hat = jax.random.normal(k1, (N, 1), dtype=jnp.float32)          # model output (N, 1)
    efs_time = jax.random.uniform(k2, (N,), dtype=jnp.float32, minval=0.1, maxval=10.0)
    efs = jnp.array([1, 0, 1, 1, 0, 1, 0, 1], dtype=jnp.float32)      # >= 1 event -> den > 0

    out = jax.block_until_ready(pairwise_hinge_loss(y_hat, efs_time, efs, margin))
    ref = _reference(y_hat, efs_time, efs, margin)
    assert jnp.allclose(out, ref, rtol=1e-5, atol=1e-5), (out, ref)

    # --- case 2: N = 13 (unaligned, exercises padding + dynamic n) ---
    k3, k4 = jax.random.split(k2)
    N2 = 13
    y_hat2 = jax.random.normal(k3, (N2, 1), dtype=jnp.float32)
    efs_time2 = jax.random.uniform(k4, (N2,), dtype=jnp.float32, minval=0.1, maxval=10.0)
    efs2 = (jnp.arange(N2) % 2).astype(jnp.float32)                   # alternating 0/1

    out2 = jax.block_until_ready(pairwise_hinge_loss(y_hat2, efs_time2, efs2, margin))
    ref2 = _reference(y_hat2, efs_time2, efs2, margin)
    assert jnp.allclose(out2, ref2, rtol=1e-5, atol=1e-5), (out2, ref2)

    print("KERNEL_OK")
</pallas_src>

<mosaic_0001>
module attributes {stable_mosaic.version = 11 : i64} {
  func.func @_pairwise_hinge_kernel(%arg0: i32, %arg1: memref<1xi32, #tpu.memory_space<smem>>, %arg2: memref<8x128xf32, #tpu.memory_space<vmem>>, %arg3: memref<1x1xf32, #tpu.memory_space<smem>>) attributes {dimension_semantics = [#tpu.dimension_semantics<arbitrary>], iteration_bounds = array<i64: 1>, scalar_prefetch = 1 : i64, scratch_operands = 0 : i64, tpu.core_type = #tpu.core_type<tc>, window_params = [{pipeline_mode = #tpu.pipeline_mode<synchronous>, transform_indices = @transform_0, window_bounds = array<i64: 8, 128>}, {transform_indices = @transform_1, window_bounds = array<i64: 1, 1>}]} {
    %c0 = arith.constant 0 : index
    %0 = memref.load %arg1[%c0] : memref<1xi32, #tpu.memory_space<smem>>
    %c0_0 = arith.constant 0 : index
    %c0_1 = arith.constant 0 : index
    %1 = vector.load %arg2[%c0_0, %c0_1] : memref<8x128xf32, #tpu.memory_space<vmem>>, vector<1x128xf32>
    %c1 = arith.constant 1 : index
    %c0_2 = arith.constant 0 : index
    %2 = vector.load %arg2[%c1, %c0_2] : memref<8x128xf32, #tpu.memory_space<vmem>>, vector<1x128xf32>
    %c2 = arith.constant 2 : index
    %c0_3 = arith.constant 0 : index
    %3 = vector.load %arg2[%c2, %c0_3] : memref<8x128xf32, #tpu.memory_space<vmem>>, vector<1x128xf32>
    %4 = vector.shape_cast %1 : vector<1x128xf32> to vector<1x128xf32>
    %5 = vector.broadcast %4 : vector<1x128xf32> to vector<128x128xf32>
    %6 = vector.shape_cast %2 : vector<1x128xf32> to vector<1x128xf32>
    %7 = vector.broadcast %6 : vector<1x128xf32> to vector<128x128xf32>
    %8 = vector.shape_cast %3 : vector<1x128xf32> to vector<1x128xf32>
    %9 = vector.broadcast %8 : vector<1x128xf32> to vector<128x128xf32>
    %10 = tpu.transpose %5, [1, 0] : vector<128x128xf32> -> vector<128x128xf32>
    %11 = tpu.transpose %7, [1, 0] : vector<128x128xf32> -> vector<128x128xf32>
    %12 = tpu.transpose %9, [1, 0] : vector<128x128xf32> -> vector<128x128xf32>
    %13 = tpu.iota {dimensions = array<i32: 0>} : vector<128x128xi32>
    %14 = tpu.iota {dimensions = array<i32: 1>} : vector<128x128xi32>
    %15 = arith.cmpi slt, %13, %14 : vector<128x128xi32>
    %16 = vector.broadcast %0 : i32 to vector<128x128xi32>
    %17 = arith.cmpi slt, %14, %16 : vector<128x128xi32>
    %18 = arith.andi %15, %17 : vector<128x128xi1>
    %19 = arith.subf %10, %5 : vector<128x128xf32>
    %20 = arith.cmpf olt, %11, %7 : vector<128x128xf32>
    %21 = arith.cmpf ogt, %11, %7 : vector<128x128xf32>
    %cst = arith.constant 0.000000e+00 : f32
    %22 = vector.broadcast %cst : f32 to vector<128x128xf32>
    %23 = arith.subf %22, %19 : vector<128x128xf32>
    %24 = arith.select %20, %23, %19 : vector<128x128xi1>, vector<128x128xf32>
    %cst_4 = arith.constant 5.000000e-01 : f32
    %25 = vector.broadcast %cst_4 : f32 to vector<128x128xf32>
    %26 = arith.addf %24, %25 : vector<128x128xf32>
    %cst_5 = arith.constant 0.000000e+00 : f32
    %27 = vector.broadcast %cst_5 : f32 to vector<128x128xf32>
    %28 = arith.maximumf %26, %27 : vector<128x128xf32>
    %cst_6 = arith.constant 0.000000e+00 : f32
    %29 = vector.broadcast %cst_6 : f32 to vector<128x128xf32>
    %30 = arith.cmpf one, %12, %29 : vector<128x128xf32>
    %cst_7 = arith.constant 0.000000e+00 : f32
    %31 = vector.broadcast %cst_7 : f32 to vector<128x128xf32>
    %32 = arith.cmpf one, %9, %31 : vector<128x128xf32>
    %33 = arith.andi %30, %32 : vector<128x128xi1>
    %34 = arith.andi %30, %20 : vector<128x128xi1>
    %35 = arith.ori %33, %34 : vector<128x128xi1>
    %36 = arith.andi %32, %21 : vector<128x128xi1>
    %37 = arith.ori %35, %36 : vector<128x128xi1>
    %38 = arith.andi %37, %18 : vector<128x128xi1>
    %39 = arith.extui %38 : vector<128x128xi1> to vector<128x128xi32>
    %40 = arith.sitofp %39 : vector<128x128xi32> to vector<128x128xf32>
    %41 = arith.mulf %28, %40 : vector<128x128xf32>
    %42 = vector.shape_cast %41 : vector<128x128xf32> to vector<1x128x128xf32>
    %cst_8 = arith.constant dense<0.000000e+00> : vector<1xf32>
    %43 = vector.multi_reduction <add>, %42, %cst_8 [1, 2] : vector<1x128x128xf32> to vector<1xf32>
    %44 = vector.shape_cast %43 : vector<1xf32> to vector<1x1x1xf32>
    %45 = vector.extract %44[0, 0, 0] : f32 from vector<1x1x1xf32>
    %46 = vector.shape_cast %40 : vector<128x128xf32> to vector<1x128x128xf32>
    %cst_9 = arith.constant dense<0.000000e+00> : vector<1xf32>
    %47 = vector.multi_reduction <add>, %46, %cst_9 [1, 2] : vector<1x128x128xf32> to vector<1xf32>
    %48 = vector.shape_cast %47 : vector<1xf32> to vector<1x1x1xf32>
    %49 = vector.extract %48[0, 0, 0] : f32 from vector<1x1x1xf32>
    %50 = arith.divf %45, %49 : f32
    %c0_10 = arith.constant 0 : index
    %c0_11 = arith.constant 0 : index
    %51 = memref.load %arg3[%c0_10, %c0_11] : memref<1x1xf32, #tpu.memory_space<smem>>
    memref.store %50, %arg3[%c0_10, %c0_11] : memref<1x1xf32, #tpu.memory_space<smem>>
    return
  }
  func.func @transform_0(%arg0: i32, %arg1: memref<1xi32, #tpu.memory_space<smem>>) -> (i32, i32) {
    %c0_i32 = arith.constant 0 : i32
    %c0_i32_0 = arith.constant 0 : i32
    %c0_i32_1 = arith.constant 0 : i32
    return %c0_i32, %c0_i32_0 : i32, i32
  }
  func.func @transform_1(%arg0: i32, %arg1: memref<1xi32, #tpu.memory_space<smem>>) -> (i32, i32) {
    %c0_i32 = arith.constant 0 : i32
    %c0_i32_0 = arith.constant 0 : i32
    %c0_i32_1 = arith.constant 0 : i32
    return %c0_i32, %c0_i32_0 : i32, i32
  }
}

</mosaic_0001>

<bundles_post_ra>
// kernel: tpu_custom_call.1
= control target key start
LH: loop header
LB: loop body
LE: loop exit
PB: predicated region body
PF: predicated region fallthrough
CT: control target
= control target key end

     0   :  { %8 = vsyncpa [#allocation5], 0  ;;  %s1322_s0 = inlined_call_operand.<no memory space> [shape: s32[1], index: 0, kind: input, shape index: {}]   ;;  %s1323_s1 = inlined_call_operand.hbm [shape: f32[8,128], index: 1, kind: input, shape index: {}]   ;;  %s1324_s2 = inlined_call_operand.hbm [shape: f32[1,1], index: 2, kind: output, shape index: {}]  }
   0x1   :  { %9 = vsyncpa [#allocation6], 0  ;;  %s591_s9 = smov [#allocation4]  }
   0x2   :  { %s16_s10 = sshll.u32 %s591_s9, 4  ;;  %s17_s10 = int_to_ptr.vmem [resolvable:$true] %s16_s10 }
   0x3   :  { %s567_s11 = scalar_lea.vmem %s17_s10, 128  ;;  %p572_p1 = scmp.lt.s32.totalorder %s17_s10, %s17_s10 }
   0x4   :  { %p568_p0 = scmp.ne.s32.totalorder %s17_s10, %s567_s11  ;;  %p573_p2 = scmp.lt.s32.totalorder %s567_s11, %s567_s11 }
   0x6   :  { %p574_p3 = por %p573_p2, %p572_p1 }
   0x8   :  { %p575_p4 = pnand %p574_p3, %p568_p0 }
   0xa   :  { %578 = shalt.err (!%p575_p4)
}
   0xb   :  { %19 = dma.hbm_to_vmem [thread:$0]  %s1323_s1, 128, %s17_s10, [#allocation5]  }
   0xc   :  { %587 = dma.done.wait [#allocation5], 128  }
   0xd   :  { %588 = vsyncadd [#allocation5], 4294967168  ;;  %v612_v0 = vld [vmem:[#allocation4] ss:$0 sm:$0xff]  ;;  %v614_v1 = vld [vmem:[#allocation4 + $0x1] ss:$0 sm:$0xff]  ;;  %v135_v19 = vlaneseq  ;;  %v170_v25 = vstv %s1322_s0 }
   0xe   :  { %39 = vxpose.xlu0.b32.start [1/16] %v612_v0, 128  ;;  %71 = vxpose.xlu1.b32.start [1/16] %v614_v1, 128  ;;  %v648_v2 = vld [vmem:[#allocation4 + $0x2] ss:$0 sm:$0xff]  ;;  %v1339_v49 = vmov 0  ;;  %v592_v59 = vmov 0.0   ;;  %s593_s18 = smov [#allocation7]  }
   0xf   :  { %v688_v21 = vshrl.u32 %v135_v19, 7  ;;  %v692_v23 = vand.u32 127, %v135_v19  ;;  %vm316_vm2 = vcmp.ne.f32.partialorder %v648_v2, 0.0 }
  0x11   :  { %v137_v26 = vadd.s32 8, %v688_v21  ;;  %vm154_vm0 = vcmp.lt.s32.totalorder %v688_v21, %v692_v23  ;;  %vm707_vm1 = vcmp.lt.s32.totalorder %v692_v23, %v170_v25  ;;  %v138_v31 = vadd.s32 16, %v688_v21 }
  0x12   :  { %40 = vxpose.xlu0.b32.cont [2/16] %v612_v0, 128  ;;  %72 = vxpose.xlu1.b32.cont [2/16] %v614_v1, 128  ;;  %vm720_vm6 = vmand %vm154_vm0, %vm707_vm1  ;;  %v139_v42 = vadd.s32 24, %v688_v21  ;;  %v140_v54 = vadd.s32 32, %v688_v21 }
  0x13   :  { %vm155_vm4 = vcmp.lt.s32.totalorder %v137_v26, %v692_v23  ;;  %vm156_vm15 = vcmp.lt.s32.totalorder %v138_v31, %v692_v23 }
  0x14   :  { %vm733_vm9 = vmand %vm155_vm4, %vm707_vm1 }
  0x16   :  { %41 = vxpose.xlu0.b32.cont [3/16] %v612_v0, 128  ;;  %73 = vxpose.xlu1.b32.cont [3/16] %v614_v1, 128 }
  0x1a   :  { %42 = vxpose.xlu0.b32.cont [4/16] %v612_v0, 128  ;;  %74 = vxpose.xlu1.b32.cont [4/16] %v614_v1, 128 }
  0x1e   :  { %43 = vxpose.xlu0.b32.cont [5/16] %v612_v0, 128  ;;  %75 = vxpose.xlu1.b32.cont [5/16] %v614_v1, 128 }
  0x22   :  { %44 = vxpose.xlu0.b32.cont [6/16] %v612_v0, 128  ;;  %76 = vxpose.xlu1.b32.cont [6/16] %v614_v1, 128 }
  0x26   :  { %45 = vxpose.xlu0.b32.cont [7/16] %v612_v0, 128  ;;  %77 = vxpose.xlu1.b32.cont [7/16] %v614_v1, 128 }
  0x2a   :  { %46 = vxpose.xlu0.b32.cont [8/16] %v612_v0, 128  ;;  %78 = vxpose.xlu1.b32.cont [8/16] %v614_v1, 128 }
  0x2e   :  { %47 = vxpose.xlu0.b32.cont [9/16] %v612_v0, 128  ;;  %79 = vxpose.xlu1.b32.cont [9/16] %v614_v1, 128 }
  0x32   :  { %48 = vxpose.xlu0.b32.cont [10/16] %v612_v0, 128  ;;  %80 = vxpose.xlu1.b32.cont [10/16] %v614_v1, 128 }
  0x36   :  { %49 = vxpose.xlu0.b32.cont [11/16] %v612_v0, 128  ;;  %81 = vxpose.xlu1.b32.cont [11/16] %v614_v1, 128 }
  0x3a   :  { %50 = vxpose.xlu0.b32.cont [12/16] %v612_v0, 128  ;;  %82 = vxpose.xlu1.b32.cont [12/16] %v614_v1, 128 }
  0x3e   :  { %51 = vxpose.xlu0.b32.cont [13/16] %v612_v0, 128  ;;  %83 = vxpose.xlu1.b32.cont [13/16] %v614_v1, 128 }
  0x42   :  { %52 = vxpose.xlu0.b32.cont [14/16] %v612_v0, 128  ;;  %84 = vxpose.xlu1.b32.cont [14/16] %v614_v1, 128 }
  0x46   :  { %53 = vxpose.xlu0.b32.cont [15/16] %v612_v0, 128  ;;  %85 = vxpose.xlu1.b32.cont [15/16] %v614_v1, 128 }
  0x4a   :  { %54 = vxpose.xlu0.b32.end [16/16] %v612_v0, 128  ;;  %86 = vxpose.xlu1.b32.end [16/16] %v614_v1, 128 }
  0x4e   :  { %103 = vxpose.xlu0.b32.start [1/16] %v648_v2, 128 }
  0x52   :  { %104 = vxpose.xlu0.b32.cont [2/16] %v648_v2, 128 }
  0x56   :  { %105 = vxpose.xlu0.b32.cont [3/16] %v648_v2, 128 }
  0x5a   :  { %106 = vxpose.xlu0.b32.cont [4/16] %v648_v2, 128 }
  0x5e   :  { %107 = vxpose.xlu0.b32.cont [5/16] %v648_v2, 128 }
  0x62   :  { %108 = vxpose.xlu0.b32.cont [6/16] %v648_v2, 128 }
  0x66   :  { %109 = vxpose.xlu0.b32.cont [7/16] %v648_v2, 128 }
  0x6a   :  { %110 = vxpose.xlu0.b32.cont [8/16] %v648_v2, 128 }
  0x6e   :  { %111 = vxpose.xlu0.b32.cont [9/16] %v648_v2, 128 }
  0x72   :  { %112 = vxpose.xlu0.b32.cont [10/16] %v648_v2, 128 }
  0x76   :  { %113 = vxpose.xlu0.b32.cont [11/16] %v648_v2, 128 }
  0x7a   :  { %114 = vxpose.xlu0.b32.cont [12/16] %v648_v2, 128 }
  0x7e   :  { %115 = vxpose.xlu0.b32.cont [13/16] %v648_v2, 128 }
  0x82   :  { %116 = vxpose.xlu0.b32.cont [14/16] %v648_v2, 128 }
  0x86   :  { %117 = vxpose.xlu0.b32.cont [15/16] %v648_v2, 128 }
  0x8a   :  { %118 = vxpose.xlu0.b32.end [16/16] %v648_v2, 128  ;;  %v55_v3 = vpop.trf.xlu0  ;;  %v87_v13 = vpop.trf.xlu1 }
  0x8b   :  { %v188_v27 = vsub.f32 %v55_v3, %v612_v0  ;;  %vm220_vm3 = vcmp.gt.f32.partialorder %v87_v13, %v614_v1  ;;  %vm204_vm7 = vcmp.lt.f32.partialorder %v87_v13, %v614_v1 }
  0x8c   :  { %vm727_vm8 = vmand %vm316_vm2, %vm220_vm3 }
  0x8d   :  { %v236_v32 = vsub.f32 0.0, %v188_v27 }
  0x8e   :  { %v56_v4 = vpop.trf.xlu0  ;;  %v88_v16 = vpop.trf.xlu1 }
  0x8f   :  { %v189_v28 = vsub.f32 %v56_v4, %v612_v0  ;;  %vm221_vm5 = vcmp.gt.f32.partialorder %v88_v16, %v614_v1  ;;  %vm205_vm10 = vcmp.lt.f32.partialorder %v88_v16, %v614_v1  ;;  %v252_v41 = vsel %vm204_vm7, %v236_v32, %v188_v27 }
  0x90   :  { %vm740_vm11 = vmand %vm316_vm2, %vm221_vm5  ;;  %v268_v50 = vadd.f32 0.5, %v252_v41  ;;  %v141_v16 = vadd.s32 40, %v688_v21 }
  0x91   :  { %v237_v36 = vsub.f32 0.0, %v189_v28 }
  0x92   :  { %v57_v5 = vpop.trf.xlu0  ;;  %v684_v18 = vpop.trf.xlu1  ;;  %v284_v57 = vmax.f32 %v268_v50, 0.0 }
  0x93   :  { %v190_v40 = vsub.f32 %v57_v5, %v612_v0  ;;  %vm222_vm12 = vcmp.gt.f32.partialorder %v684_v18, %v614_v1  ;;  %v253_v43 = vsel %vm205_vm10, %v237_v36, %v189_v28 }
  0x94   :  { %vm755_vm3 = vmand %vm316_vm2, %vm222_vm12  ;;  %vm206_vm12 = vcmp.lt.f32.partialorder %v684_v18, %v614_v1  ;;  %v269_v52 = vadd.f32 0.5, %v253_v43  ;;  %v1347_v18 = vmov 0 }
  0x95   :  { %v238_v46 = vsub.f32 0.0, %v190_v40 }
  0x96   :  { %v58_v6 = vpop.trf.xlu0  ;;  %v694_v24 = vpop.trf.xlu1  ;;  %v285_v62 = vmax.f32 %v269_v52, 0.0 }
  0x97   :  { %v191_v51 = vsub.f32 %v58_v6, %v612_v0  ;;  %v254_v55 = vsel %vm206_vm12, %v238_v46, %v190_v40 }
  0x98   :  { %v270_v4 = vadd.f32 0.5, %v254_v55 }
  0x99   :  { %v239_v58 = vsub.f32 0.0, %v191_v51 }
  0x9a   :  { %v666_v7 = vpop.trf.xlu0  ;;  %v716_v33 = vpop.trf.xlu1  ;;  %v286_v28 = vmax.f32 %v270_v4, 0.0 }
  0x9b   :  { %v192_v63 = vsub.f32 %v666_v7, %v612_v0 }
  0x9d   :  { %v240_v26 = vsub.f32 0.0, %v192_v63 }
  0x9e   :  { %v668_v8 = vpop.trf.xlu0  ;;  %v759_v47 = vpop.trf.xlu1 }
  0x9f   :  { %v193_v31 = vsub.f32 %v668_v8, %v612_v0 }
  0xa1   :  { %v241_v40 = vsub.f32 0.0, %v193_v31 }
  0xa2   :  { %v670_v9 = vpop.trf.xlu0  ;;  %v814_v3 = vpop.trf.xlu1 }
  0xa3   :  { %v194_v44 = vsub.f32 %v670_v9, %v612_v0 }
  0xa6   :  { %v672_v10 = vpop.trf.xlu0  ;;  %v857_v35 = vpop.trf.xlu1 }
  0xa7   :  { %v195_v56 = vsub.f32 %v672_v10, %v612_v0 }
  0xaa   :  { %v674_v11 = vpop.trf.xlu0  ;;  %v904_v48 = vpop.trf.xlu1 }
  0xae   :  { %v676_v12 = vpop.trf.xlu0 }
  0xb2   :  { %v678_v14 = vpop.trf.xlu0 }
  0xb6   :  { %v680_v15 = vpop.trf.xlu0 }
  0xba   :  { %v682_v17 = vpop.trf.xlu0 }
  0xbe   :  { %v686_v20 = vpop.trf.xlu0 }
  0xc2   :  { %v690_v22 = vpop.trf.xlu0 }
  0xc6   :  { %v702_v29 = vpop.trf.xlu0 }
  0xca   :  { %v119_v37 = vpop.trf.xlu0 }
  0xcb   :  { %vm300_vm13 = vcmp.ne.f32.partialorder %v119_v37, 0.0  ;;  %v142_v37 = vadd.s32 48, %v688_v21 }
  0xcc   :  { %vm317_vm14 = vmand %vm300_vm13, %vm316_vm2 }
  0xcd   :  { %vm333_vm0 = vmand %vm300_vm13, %vm204_vm7 }
  0xce   :  { %vm349_vm4 = vmor %vm317_vm14, %vm333_vm0  ;;  %v120_v45 = vpop.trf.xlu0  ;;  %vm223_vm14 = vcmp.gt.f32.partialorder %v694_v24, %v614_v1  ;;  %vm157_vm0 = vcmp.lt.s32.totalorder %v139_v42, %v692_v23 }
  0xcf   :  { %vm763_vm5 = vmor %vm349_vm4, %vm727_vm8  ;;  %vm301_vm7 = vcmp.ne.f32.partialorder %v120_v45, 0.0 }
  0xd0   :  { %vm769_vm13 = vmand %vm156_vm15, %vm707_vm1 }
  0xd1   :  { %v1340_v49 = vsel %vm769_vm13, 4294967295, %v1339_v49  ;;  %vm397_vm8 = vmand %vm763_vm5, %vm720_vm6 }
  0xd2   :  { %vm318_vm15 = vmand %vm301_vm7, %vm316_vm2  ;;  %v121_v53 = vpop.trf.xlu0  ;;  %v798_v60 = vsel %vm397_vm8, 1.0, %v592_v59  ;;  %vm224_vm8 = vcmp.gt.f32.partialorder %v716_v33, %v614_v1 }
  0xd3   :  { %vm334_vm4 = vmand %vm301_vm7, %vm205_vm10  ;;  %vm302_vm5 = vcmp.ne.f32.partialorder %v121_v53, 0.0  ;;  %v445_v7 = vmul.f32 %v798_v60, %v284_v57  ;;  %v242_v53 = vsub.f32 0.0, %v194_v44 }
  0xd4   :  { %vm793_vm13 = vmand %vm316_vm2, %vm223_vm14  ;;  %vm207_vm14 = vcmp.lt.f32.partialorder %v694_v24, %v614_v1 }
  0xd5   :  { %vm350_vm6 = vmor %vm318_vm15, %vm334_vm4  ;;  %v255_v19 = vsel %vm207_vm14, %v239_v58, %v191_v51 }
  0xd6   :  { %vm382_vm10 = vmor %vm350_vm6, %vm740_vm11  ;;  %v122_v6 = vpop.trf.xlu0  ;;  %v271_v34 = vadd.f32 0.5, %v255_v19  ;;  %v196_v19 = vsub.f32 %v674_v11, %v612_v0  ;;  %v145_v11 = vadd.s32 72, %v688_v21 }
  0xd7   :  { %vm804_vm7 = vmand %vm157_vm0, %vm707_vm1  ;;  %vm158_vm0 = vcmp.lt.s32.totalorder %v140_v54, %v692_v23 }
  0xd8   :  { %vm398_vm11 = vmand %vm382_vm10, %vm733_vm9  ;;  %vm303_vm10 = vcmp.ne.f32.partialorder %v122_v6, 0.0  ;;  %v287_v43 = vmax.f32 %v271_v34, 0.0  ;;  %v959_v6 = vpop.trf.xlu1 }
  0xd9   :  { %v819_v5 = vsel %vm398_vm11, 1.0, %v592_v59  ;;  %vm319_vm15 = vmand %vm302_vm5, %vm316_vm2 }
  0xda   :  { %v446_v13 = vmul.f32 %v819_v5, %v285_v62  ;;  %vm335_vm9 = vmand %vm302_vm5, %vm206_vm12  ;;  %vm208_vm5 = vcmp.lt.f32.partialorder %v716_v33, %v614_v1  ;;  %v123_v32 = vpop.trf.xlu0  ;;  %v144_v62 = vadd.s32 64, %v688_v21 }
  0xdb   :  { %vm837_vm4 = vmand %vm316_vm2, %vm224_vm8  ;;  %vm225_vm8 = vcmp.gt.f32.partialorder %v759_v47, %v614_v1  ;;  %v256_v38 = vsel %vm208_vm5, %v240_v26, %v192_v63 }
  0xdc   :  { %vm351_vm6 = vmor %vm319_vm15, %vm335_vm9  ;;  %v461_v27 = vadd.f32 %v446_v13, %v445_v7  ;;  %vm1349_vm15 = vnez %v1340_v49  ;;  %v272_v45 = vadd.f32 0.5, %v256_v38  ;;  %v143_v49 = vadd.s32 56, %v688_v21  ;;  %v999_v34 = vpop.trf.xlu1 }
  0xdd   :  { %vm383_vm11 = vmor %vm351_vm6, %vm755_vm3  ;;  %v197_v38 = vsub.f32 %v676_v12, %v612_v0  ;;  %v146_v12 = vadd.s32 80, %v688_v21 }
  0xde   :  { %vm845_vm12 = vmand %vm158_vm0, %vm707_vm1  ;;  %vm159_vm0 = vcmp.lt.s32.totalorder %v141_v16, %v692_v23  ;;  %v124_v42 = vpop.trf.xlu0  ;;  %v288_v55 = vmax.f32 %v272_v45, 0.0 }
  0xdf   :  { %v1348_v18 = vsel %vm845_vm12, 4294967295, %v1347_v18  ;;  %vm399_vm9 = vmand %vm383_vm11, %vm1349_vm15 }
  0xe0   :  { %v860_v36 = vsel %vm399_vm9, 1.0, %v592_v59  ;;  %vm320_vm3 = vmand %vm303_vm10, %vm316_vm2  ;;  %vm304_vm9 = vcmp.ne.f32.partialorder %v123_v32, 0.0  ;;  %v244_v32 = vsub.f32 0.0, %v196_v19 }
  0xe1   :  { %v447_v8 = vmul.f32 %v860_v36, %v286_v28  ;;  %vm336_vm6 = vmand %vm303_vm10, %vm207_vm14  ;;  %vm209_vm10 = vcmp.lt.f32.partialorder %v759_v47, %v614_v1  ;;  %v243_v47 = vsub.f32 0.0, %v195_v56 }
  0xe2   :  { %vm877_vm11 = vmand %vm316_vm2, %vm225_vm8  ;;  %vm226_vm8 = vcmp.gt.f32.partialorder %v814_v3, %v614_v1  ;;  %v257_v50 = vsel %vm209_vm10, %v241_v40, %v193_v31  ;;  %v125_v52 = vpop.trf.xlu0 }
  0xe3   :  { %vm352_vm15 = vmor %vm320_vm3, %vm336_vm6  ;;  %v462_v41 = vadd.f32 %v461_v27, %v447_v8  ;;  %v273_v57 = vadd.f32 0.5, %v257_v50  ;;  %v1365_v8 = vmov 0  ;;  %v1053_v50 = vpop.trf.xlu1 }
  0xe4   :  { %vm384_vm12 = vmor %vm352_vm15, %vm793_vm13  ;;  %vm305_vm15 = vcmp.ne.f32.partialorder %v124_v42, 0.0 }
  0xe5   :  { %vm885_vm14 = vmand %vm159_vm0, %vm707_vm1  ;;  %vm160_vm0 = vcmp.lt.s32.totalorder %v142_v37, %v692_v23  ;;  %v289_v16 = vmax.f32 %v273_v57, 0.0 }
  0xe6   :  { %vm400_vm13 = vmand %vm384_vm12, %vm804_vm7  ;;  %v126_v10 = vpop.trf.xlu0 }
  0xe7   :  { %v898_v46 = vsel %vm400_vm13, 1.0, %v592_v59  ;;  %vm321_vm3 = vmand %vm304_vm9, %vm316_vm2  ;;  %vm227_vm13 = vcmp.gt.f32.partialorder %v857_v35, %v614_v1 }
  0xe8   :  { %v448_v9 = vmul.f32 %v898_v46, %v287_v43  ;;  %vm337_vm6 = vmand %vm304_vm9, %vm208_vm5 }
  0xe9   :  { %vm917_vm7 = vmand %vm316_vm2, %vm226_vm8  ;;  %vm210_vm8 = vcmp.lt.f32.partialorder %v814_v3, %v614_v1 }
  0xea   :  { %vm353_vm12 = vmor %vm321_vm3, %vm337_vm6  ;;  %v463_v54 = vadd.f32 %v462_v41, %v448_v9  ;;  %vm1358_vm3 = vnez %v1348_v18  ;;  %v258_v63 = vsel %vm210_vm8, %v242_v53, %v194_v44  ;;  %v127_v27 = vpop.trf.xlu0  ;;  %v245_v44 = vsub.f32 0.0, %v197_v38 }
  0xeb   :  { %vm385_vm5 = vmor %vm353_vm12, %vm837_vm4  ;;  %v274_v25 = vadd.f32 0.5, %v258_v63  ;;  %v1095_v63 = vpop.trf.xlu1 }
  0xec   :  { %vm925_vm9 = vmand %vm160_vm0, %vm707_vm1  ;;  %vm161_vm0 = vcmp.lt.s32.totalorder %v143_v49, %v692_v23  ;;  %v198_v49 = vsub.f32 %v678_v14, %v612_v0 }
  0xed   :  { %vm401_vm6 = vmand %vm385_vm5, %vm1358_vm3  ;;  %v290_v37 = vmax.f32 %v274_v25, 0.0 }
  0xee   :  { %v938_v58 = vsel %vm401_vm6, 1.0, %v592_v59  ;;  %vm322_vm4 = vmand %vm305_vm15, %vm316_vm2  ;;  %vm306_vm6 = vcmp.ne.f32.partialorder %v125_v52, 0.0  ;;  %v128_v39 = vpop.trf.xlu0 }
  0xef   :  { %v449_v61 = vmul.f32 %v938_v58, %v288_v55  ;;  %vm338_vm12 = vmand %vm305_vm15, %vm209_vm10  ;;  %v1142_v31 = vpop.trf.xlu1  ;;  %v202_v55 = vsub.f32 %v690_v22, %v612_v0 }
  0xf0   :  { %vm955_vm5 = vmand %vm316_vm2, %vm227_vm13  ;;  %vm211_vm13 = vcmp.lt.f32.partialorder %v857_v35, %v614_v1 }
  0xf1   :  { %vm354_vm3 = vmor %vm322_vm4, %vm338_vm12  ;;  %v464_v7 = vadd.f32 %v463_v54, %v449_v61  ;;  %vm228_vm4 = vcmp.gt.f32.partialorder %v904_v48, %v614_v1  ;;  %v259_v28 = vsel %vm211_vm13, %v243_v47, %v195_v56  ;;  %v147_v54 = vadd.s32 88, %v688_v21 }
  0xf2   :  { %vm386_vm10 = vmor %vm354_vm3, %vm877_vm11  ;;  %v275_v40 = vadd.f32 0.5, %v259_v28  ;;  %v129_v51 = vpop.trf.xlu0  ;;  %v246_v56 = vsub.f32 0.0, %v198_v49 }
  0xf3   :  { %vm965_vm15 = vmand %vm161_vm0, %vm707_vm1  ;;  %vm162_vm0 = vcmp.lt.s32.totalorder %v144_v62, %v692_v23  ;;  %v1197_v35 = vpop.trf.xlu1 }
  0xf4   :  { %vm402_vm12 = vmand %vm386_vm10, %vm885_vm14  ;;  %v291_v9 = vmax.f32 %v275_v40, 0.0 }
  0xf5   :  { %v978_v26 = vsel %vm402_vm12, 1.0, %v592_v59  ;;  %vm323_vm11 = vmand %vm306_vm6, %vm316_vm2  ;;  %vm307_vm12 = vcmp.ne.f32.partialorder %v126_v10, 0.0  ;;  %v199_v10 = vsub.f32 %v680_v15, %v612_v0 }
  0xf6   :  { %v450_v18 = vmul.f32 %v978_v26, %v289_v16  ;;  %vm339_vm3 = vmand %vm306_vm6, %vm210_vm8  ;;  %v130_v47 = vpop.trf.xlu0 }
  0xf7   :  { %vm995_vm14 = vmand %vm316_vm2, %vm228_vm4  ;;  %vm212_vm4 = vcmp.lt.f32.partialorder %v904_v48, %v614_v1  ;;  %v1373_v48 = vmov 0 }
  0xf8   :  { %vm355_vm10 = vmor %vm323_vm11, %vm339_vm3  ;;  %v465_v3 = vadd.f32 %v464_v7, %v450_v18  ;;  %vm229_vm11 = vcmp.gt.f32.partialorder %v959_v6, %v614_v1  ;;  %v260_v42 = vsel %vm212_vm4, %v244_v32, %v196_v19  ;;  %v148_v7 = vadd.s32 96, %v688_v21 }
  0xf9   :  { %vm387_vm8 = vmor %vm355_vm10, %vm917_vm7  ;;  %v276_v52 = vadd.f32 0.5, %v260_v42  ;;  %v247_v19 = vsub.f32 0.0, %v199_v10  ;;  %v200_v18 = vsub.f32 %v682_v17, %v612_v0 }
  0xfa   :  { %vm1005_vm6 = vmand %vm162_vm0, %vm707_vm1  ;;  %vm163_vm0 = vcmp.lt.s32.totalorder %v145_v11, %v692_v23  ;;  %v131_v32 = vpop.trf.xlu0 }
  0xfb   :  { %v1366_v8 = vsel %vm1005_vm6, 4294967295, %v1365_v8  ;;  %vm403_vm3 = vmand %vm387_vm8, %vm925_vm9  ;;  %v292_v61 = vmax.f32 %v276_v52, 0.0  ;;  %v151_v52 = vadd.s32 120, %v688_v21 }
  0xfc   :  { %v1018_v41 = vsel %vm403_vm3, 1.0, %v592_v59  ;;  %vm324_vm7 = vmand %vm307_vm12, %vm316_vm2  ;;  %vm308_vm3 = vcmp.ne.f32.partialorder %v127_v27, 0.0 }
  0xfd   :  { %v451_v24 = vmul.f32 %v1018_v41, %v290_v37  ;;  %vm340_vm10 = vmand %vm307_vm12, %vm211_vm13  ;;  %vm213_vm12 = vcmp.lt.f32.partialorder %v959_v6, %v614_v1 }
  0xfe   :  { %vm1035_vm9 = vmand %vm316_vm2, %vm229_vm11  ;;  %vm230_vm11 = vcmp.gt.f32.partialorder %v999_v34, %v614_v1  ;;  %v261_v33 = vsel %vm213_vm12, %v245_v44, %v197_v38  ;;  %v248_v38 = vsub.f32 0.0, %v200_v18 }
  0xff   :  { %vm356_vm8 = vmor %vm324_vm7, %vm340_vm10  ;;  %v466_v45 = vadd.f32 %v465_v3, %v451_v24  ;;  %v277_v62 = vadd.f32 0.5, %v261_v33  ;;  %v149_v3 = vadd.s32 104, %v688_v21  ;;  %v201_v24 = vsub.f32 %v686_v20, %v612_v0 }
 0x100   :  { %vm388_vm6 = vmor %vm356_vm8, %vm955_vm5  ;;  %vm309_vm8 = vcmp.ne.f32.partialorder %v128_v39, 0.0  ;;  %v150_v20 = vadd.s32 112, %v688_v21 }
 0x101   :  { %vm1043_vm13 = vmand %vm163_vm0, %vm707_vm1  ;;  %vm164_vm0 = vcmp.lt.s32.totalorder %v146_v12, %v692_v23  ;;  %v293_v27 = vmax.f32 %v277_v62, 0.0 }
 0x102   :  { %vm404_vm5 = vmand %vm388_vm6, %vm965_vm15 }
 0x103   :  { %v1058_v53 = vsel %vm404_vm5, 1.0, %v592_v59  ;;  %vm325_vm7 = vmand %vm308_vm3, %vm316_vm2 }
 0x104   :  { %v452_v14 = vmul.f32 %v1058_v53, %v291_v9  ;;  %vm341_vm10 = vmand %vm308_vm3, %vm212_vm4  ;;  %vm214_vm3 = vcmp.lt.f32.partialorder %v999_v34, %v614_v1  ;;  %v132_v9 = vpop.trf.xlu0 }
 0x105   :  { %vm1075_vm15 = vmand %vm316_vm2, %vm230_vm11  ;;  %vm231_vm11 = vcmp.gt.f32.partialorder %v1053_v50, %v614_v1  ;;  %v262_v13 = vsel %vm214_vm3, %v246_v56, %v198_v49  ;;  %v249_v49 = vsub.f32 0.0, %v201_v24 }
 0x106   :  { %vm357_vm6 = vmor %vm325_vm7, %vm341_vm10  ;;  %v467_v57 = vadd.f32 %v466_v45, %v452_v14  ;;  %vm1375_vm7 = vnez %v1366_v8  ;;  %v278_v11 = vadd.f32 0.5, %v262_v13 }
 0x107   :  { %vm389_vm5 = vmor %vm357_vm6, %vm995_vm14 }
 0x108   :  { %vm1083_vm4 = vmand %vm164_vm0, %vm707_vm1  ;;  %vm165_vm0 = vcmp.lt.s32.totalorder %v147_v54, %v692_v23  ;;  %v294_v40 = vmax.f32 %v278_v11, 0.0  ;;  %v485_v54 = vadd.f32 %v819_v5, %v798_v60 }
 0x109   :  { %v1374_v48 = vsel %vm1083_vm4, 4294967295, %v1373_v48  ;;  %vm405_vm10 = vmand %vm389_vm5, %vm1375_vm7 }
 0x10a   :  { %v1098_v4 = vsel %vm405_vm10, 1.0, %v592_v59  ;;  %vm326_vm14 = vmand %vm309_vm8, %vm316_vm2  ;;  %vm310_vm10 = vcmp.ne.f32.partialorder %v129_v51, 0.0  ;;  %v1387_v51 = vmov 0  ;;  %v486_v21 = vadd.f32 %v860_v36, %v485_v54  ;;  %v102_v36 = vpop.trf.xlu1 }
 0x10b   :  { %v453_v15 = vmul.f32 %v1098_v4, %v292_v61  ;;  %vm342_vm6 = vmand %vm309_vm8, %vm213_vm12  ;;  %vm215_vm8 = vcmp.lt.f32.partialorder %v1053_v50, %v614_v1 }
 0x10c   :  { %vm1115_vm5 = vmand %vm316_vm2, %vm231_vm11  ;;  %vm232_vm11 = vcmp.gt.f32.partialorder %v1095_v63, %v614_v1  ;;  %v263_v8 = vsel %vm215_vm8, %v247_v19, %v199_v10  ;;  %v133_v10 = vpop.trf.xlu0 }
 0x10d   :  { %vm358_vm7 = vmor %vm326_vm14, %vm342_vm6  ;;  %v468_v25 = vadd.f32 %v467_v57, %v453_v15  ;;  %v279_v12 = vadd.f32 0.5, %v263_v8  ;;  %v487_v57 = vadd.f32 %v898_v46, %v486_v21 }
 0x10e   :  { %vm390_vm4 = vmor %vm358_vm7, %vm1035_vm9  ;;  %vm311_vm7 = vcmp.ne.f32.partialorder %v130_v47, 0.0  ;;  %v203_v47 = vsub.f32 %v702_v29, %v612_v0 }
 0x10f   :  { %vm1123_vm12 = vmand %vm165_vm0, %vm707_vm1  ;;  %vm166_vm0 = vcmp.lt.s32.totalorder %v148_v7, %v692_v23  ;;  %v295_v14 = vmax.f32 %v279_v12, 0.0  ;;  %v488_v15 = vadd.f32 %v938_v58, %v487_v57 }
 0x110   :  { %vm406_vm14 = vmand %vm390_vm4, %vm1043_vm13  ;;  %v251_v16 = vsub.f32 0.0, %v203_v47 }
 0x111   :  { %v1136_v28 = vsel %vm406_vm14, 1.0, %v592_v59  ;;  %vm327_vm9 = vmand %vm310_vm10, %vm316_vm2  ;;  %vm233_vm14 = vcmp.gt.f32.partialorder %v1142_v31, %v614_v1  ;;  %v489_v29 = vadd.f32 %v978_v26, %v488_v15 }
 0x112   :  { %v454_v17 = vmul.f32 %v1136_v28, %v293_v27  ;;  %vm343_vm6 = vmand %vm310_vm10, %vm214_vm3  ;;  %v134_v27 = vpop.trf.xlu0 }
 0x113   :  { %vm1155_vm13 = vmand %vm316_vm2, %vm232_vm11  ;;  %vm216_vm11 = vcmp.lt.f32.partialorder %v1095_v63, %v614_v1  ;;  %v250_v63 = vsub.f32 0.0, %v202_v55  ;;  %v490_v6 = vadd.f32 %v1018_v41, %v489_v29 }
 0x114   :  { %vm359_vm4 = vmor %vm327_vm9, %vm343_vm6  ;;  %v469_v39 = vadd.f32 %v468_v25, %v454_v17  ;;  %vm1384_vm9 = vnez %v1374_v48  ;;  %v264_v44 = vsel %vm216_vm11, %v248_v38, %v200_v18 }
 0x115   :  { %vm391_vm3 = vmor %vm359_vm4, %vm1075_vm15  ;;  %v280_v33 = vadd.f32 0.5, %v264_v44  ;;  %v491_v30 = vadd.f32 %v1058_v53, %v490_v6 }
 0x116   :  { %vm1163_vm10 = vmand %vm166_vm0, %vm707_vm1  ;;  %vm167_vm0 = vcmp.lt.s32.totalorder %v149_v3, %v692_v23 }
 0x117   :  { %vm407_vm6 = vmand %vm391_vm3, %vm1384_vm9  ;;  %v296_v62 = vmax.f32 %v280_v33, 0.0 }
 0x118   :  { %v1176_v42 = vsel %vm407_vm6, 1.0, %v592_v59  ;;  %vm328_vm15 = vmand %vm311_vm7, %vm316_vm2  ;;  %vm312_vm6 = vcmp.ne.f32.partialorder %v131_v32, 0.0 }
 0x119   :  { %v455_v43 = vmul.f32 %v1176_v42, %v294_v40  ;;  %vm344_vm4 = vmand %vm311_vm7, %vm215_vm8 }
 0x11a   :  { %vm1193_vm3 = vmand %vm316_vm2, %vm233_vm14  ;;  %vm217_vm14 = vcmp.lt.f32.partialorder %v1142_v31, %v614_v1  ;;  %v492_v31 = vadd.f32 %v1098_v4, %v491_v30 }
 0x11b   :  { %vm360_vm9 = vmor %vm328_vm15, %vm344_vm4  ;;  %v470_v50 = vadd.f32 %v469_v39, %v455_v43  ;;  %vm234_vm15 = vcmp.gt.f32.partialorder %v1197_v35, %v614_v1  ;;  %vm168_vm4 = vcmp.lt.s32.totalorder %v150_v20, %v692_v23  ;;  %v265_v22 = vsel %vm217_vm14, %v249_v49, %v201_v24 }
 0x11c   :  { %vm392_vm8 = vmor %vm360_vm9, %vm1115_vm5  ;;  %v281_v46 = vadd.f32 0.5, %v265_v22  ;;  %v493_v32 = vadd.f32 %v1136_v28, %v492_v31 }
 0x11d   :  { %vm1203_vm7 = vmand %vm167_vm0, %vm707_vm1 }
 0x11e   :  { %v1388_v51 = vsel %vm1203_vm7, 4294967295, %v1387_v51  ;;  %vm408_vm5 = vmand %vm392_vm8, %vm1123_vm12  ;;  %v297_v26 = vmax.f32 %v281_v46, 0.0  ;;  %v494_v4 = vadd.f32 %v1176_v42, %v493_v32 }
 0x11f   :  { %v1219_v56 = vsel %vm408_vm5, 1.0, %v592_v59  ;;  %vm329_vm0 = vmand %vm312_vm6, %vm316_vm2  ;;  %vm313_vm5 = vcmp.ne.f32.partialorder %v132_v9, 0.0 }
 0x120   :  { %v456_v60 = vmul.f32 %v1219_v56, %v295_v14  ;;  %vm345_vm12 = vmand %vm312_vm6, %vm216_vm11  ;;  %vm169_vm6 = vcmp.lt.s32.totalorder %v151_v52, %v692_v23  ;;  %v495_v38 = vadd.f32 %v1219_v56, %v494_v4 }
 0x121   :  { %vm1236_vm9 = vmand %vm316_vm2, %vm234_vm15  ;;  %vm235_vm15 = vcmp.gt.f32.partialorder %v102_v36, %v614_v1 }
 0x122   :  { %vm361_vm8 = vmor %vm329_vm0, %vm345_vm12  ;;  %v471_v48 = vadd.f32 %v470_v50, %v456_v60 }
 0x123   :  { %vm393_vm7 = vmor %vm361_vm8, %vm1155_vm13  ;;  %vm218_vm13 = vcmp.lt.f32.partialorder %v1197_v35, %v614_v1  ;;  %vm314_vm8 = vcmp.ne.f32.partialorder %v133_v10, 0.0 }
 0x124   :  { %vm1245_vm11 = vmand %vm168_vm4, %vm707_vm1  ;;  %v266_v58 = vsel %vm218_vm13, %v250_v63, %v202_v55 }
 0x125   :  { %vm409_vm0 = vmand %vm393_vm7, %vm1163_vm10  ;;  %v282_v23 = vadd.f32 0.5, %v266_v58 }
 0x126   :  { %v544_v7 = vsel %vm409_vm0, 1.0, %v592_v59  ;;  %vm330_vm4 = vmand %vm313_vm5, %vm316_vm2 }
 0x127   :  { %v457_v13 = vmul.f32 %v544_v7, %v296_v62  ;;  %vm346_vm12 = vmand %vm313_vm5, %vm217_vm14  ;;  %vm1397_vm5 = vnez %v1388_v51  ;;  %v298_v53 = vmax.f32 %v282_v23, 0.0  ;;  %v496_v2 = vadd.f32 %v544_v7, %v495_v38 }
 0x128   :  { %vm1268_vm10 = vmand %vm316_vm2, %vm235_vm15 }
 0x129   :  { %vm362_vm7 = vmor %vm330_vm4, %vm346_vm12  ;;  %v472_v25 = vadd.f32 %v471_v48, %v457_v13  ;;  %vm219_vm4 = vcmp.lt.f32.partialorder %v102_v36, %v614_v1  ;;  %vm315_vm12 = vcmp.ne.f32.partialorder %v134_v27, 0.0 }
 0x12a   :  { %vm394_vm0 = vmor %vm362_vm7, %vm1193_vm3  ;;  %v267_v41 = vsel %vm219_vm4, %v251_v16, %v203_v47 }
 0x12b   :  { %vm1282_vm14 = vmand %vm169_vm6, %vm707_vm1  ;;  %v283_v8 = vadd.f32 0.5, %v267_v41 }
 0x12c   :  { %vm410_vm15 = vmand %vm394_vm0, %vm1397_vm5 }
 0x12d   :  { %v545_v18 = vsel %vm410_vm15, 1.0, %v592_v59  ;;  %vm331_vm3 = vmand %vm314_vm8, %vm316_vm2  ;;  %v299_v39 = vmax.f32 %v283_v8, 0.0 }
 0x12e   :  { %v458_v11 = vmul.f32 %v545_v18, %v297_v26  ;;  %vm347_vm1 = vmand %vm314_vm8, %vm218_vm13  ;;  %v497_v24 = vadd.f32 %v545_v18, %v496_v2 }
 0x12f   :  { %vm363_vm6 = vmor %vm331_vm3, %vm347_vm1 }
 0x130   :  { %vm395_vm7 = vmor %vm363_vm6, %vm1236_vm9  ;;  %v473_v17 = vadd.f32 %v472_v25, %v458_v11 }
 0x131   :  { %vm411_vm0 = vmand %vm395_vm7, %vm1245_vm11 }
 0x132   :  { %v546_v3 = vsel %vm411_vm0, 1.0, %v592_v59  ;;  %vm332_vm13 = vmand %vm315_vm12, %vm316_vm2 }
 0x133   :  { %vm348_vm8 = vmand %vm315_vm12, %vm219_vm4  ;;  %v459_v37 = vmul.f32 %v546_v3, %v298_v53  ;;  %v498_v12 = vadd.f32 %v546_v3, %v497_v24 }
 0x134   :  { %vm364_vm5 = vmor %vm332_vm13, %vm348_vm8 }
 0x135   :  { %vm396_vm9 = vmor %vm364_vm5, %vm1268_vm10  ;;  %v474_v40 = vadd.f32 %v473_v17, %v459_v37 }
 0x136   :  { %vm412_vm11 = vmand %vm396_vm9, %vm1282_vm14 }
 0x137   :  { %v547_v28 = vsel %vm412_vm11, 1.0, %v592_v59 }
 0x138   :  { %v460_v34 = vmul.f32 %v547_v28, %v299_v39  ;;  %v499_v42 = vadd.f32 %v547_v28, %v498_v12 }
 0x13a   :  { %v475_v1 = vadd.f32 %v474_v40, %v460_v34 }
 0x13c   :  { %476 = vadd.xlane.f32.xlu1 %v475_v1 }
 0x140   :  { %500 = vadd.xlane.f32.xlu1 %v499_v42 }
 0x1c5   :  { %v477_v43 = vpop.xlane.xlu1 %476 }
 0x1c6   :  { %v478_v20 = vrot.slane %v477_v43, 4 }
 0x1c8   :  { %v479_v44 = vadd.f32 %v478_v20, %v477_v43 }
 0x1c9   :  { %v501_v45 = vpop.xlane.xlu1 %500 }
 0x1ca   :  { %v480_v35 = vrot.slane %v479_v44, 2  ;;  %v502_v9 = vrot.slane %v501_v45, 4 }
 0x1cc   :  { %v503_v49 = vadd.f32 %v502_v9, %v501_v45  ;;  %v481_v50 = vadd.f32 %v480_v35, %v479_v44 }
 0x1ce   :  { %v504_v51 = vrot.slane %v503_v49, 2  ;;  %v482_v52 = vrot.slane %v481_v50, 1 }
 0x1d0   :  { %v505_v59 = vadd.f32 %v504_v51, %v503_v49  ;;  %v483_v14 = vadd.f32 %v482_v52, %v481_v50 }
 0x1d2   :  { %548 = vpush %v483_v14  ;;  %v506_v54 = vrot.slane %v505_v59, 1 }
 0x1d4   :  { %v507_v33 = vadd.f32 %v506_v54, %v505_v59 }
 0x1d6   :  { %550 = vpush %v507_v33 }
 0x203   :  { %s549_s0 = spop %548 }
 0x207   :  { %s551_s15 = spop %550 }
 0x208   :  { %v509_v55 = vstv %s551_s15 }
 0x209   :  { %557 = vrcp.f32 %v509_v55 }
 0x216   :  { %v558_v56 = vpop.eup %557 }
 0x217   :  { %552 = vpush %v558_v56 }
 0x248   :  { %s553_s16 = spop %552 }
 0x249   :  { %s512_s17 = smul.f32 %s553_s16, %s549_s0 }
 0x24b   :  { %514 = sst [smem:[#allocation7]] %s512_s17 }
 0x24c   :  { %522 = dma.smem_to_hbm %s593_s18, 16, %s1324_s2, [#allocation6]  }
 0x24d   :  { %589 = dma.done.wait [#allocation6], 16  }
 0x24e   :  { %590 = vsyncadd [#allocation6], 4294967280 }
 0x24f   :  { %526 = sfence }
 0x250   :  { %527 = vsyncpa [#allocation5], 1 }
 0x251   :  { %528 = vsyncpa [#allocation6], 1 }

</bundles_post_ra>
